<compile_context>
chip_gen: v7x
topology: tpu7x:2x2x1
jax: 0.10.0
libtpu: 0.0.40
codegen_flags: <defaults>
</compile_context>

<pallas_src>
import functools
import math

import jax
import jax.numpy as jnp
from jax.experimental import pallas as pl
from jax.experimental.pallas import tpu as pltpu


# ----------------------------------------------------------------------------
# helpers
# ----------------------------------------------------------------------------
def _round_up(n, m):
    return ((n + m - 1) // m) * m


def _pad_k(n):
    # Contraction pad for *streamed* activations: multiple of 16 (bf16 sublane
    # packing), not 128 -> tiny feature dims are not inflated in HBM/DMA.
    return _round_up(max(int(n), 1), 16)


def _pad_n(n):
    # Output / lane pad: multiple of 128 -> lane-dense loads & unmasked stores.
    return _round_up(max(int(n), 1), 128)


def _pad_weight(w, k_pad, n_pad):
    din, dout = w.shape
    wp = jnp.pad(w, ((0, k_pad - din), (0, n_pad - dout)))
    return wp.astype(jnp.bfloat16)          # bf16 MXU path, half VMEM/DMA


def _pad_bias(b, n_pad):
    bp = jnp.pad(b, (0, n_pad - b.shape[0]))
    return bp.reshape(1, -1).astype(jnp.float32)   # bias add stays f32


def _apply_act(z, activation):
    if activation == "tanh":
        return jnp.tanh(z)
    return jnp.maximum(z, 0.0)              # relu (and the PyTorch else-branch)


def _choose_tm(B):
    if B <= 8:
        return 8
    # >= 2 grid steps so ("parallel",) can shard over v7x's two TensorCores.
    return min(512, _round_up(-(-B // 2), 8))


# ----------------------------------------------------------------------------
# pipeline_mode=pl.Buffered(1) feature probe (fall back to plain specs if the
# running JAX does not support it -- keeps the kernel runnable everywhere).
# ----------------------------------------------------------------------------
_BUFFERED_OK = None


def _buffered_supported():
    global _BUFFERED_OK
    if _BUFFERED_OK is not None:
        return _BUFFERED_OK
    ok = False
    if hasattr(pl, "Buffered"):
        try:
            w = jnp.zeros((8, 128), jnp.float32)

            def k(w_ref, o_ref):
                o_ref[...] = w_ref[...]

            out = pl.pallas_call(
                k,
                out_shape=jax.ShapeDtypeStruct((16, 128), jnp.float32),
                grid=(2,),
                in_specs=[pl.BlockSpec((8, 128), lambda i: (0, 0),
                                       pipeline_mode=pl.Buffered(1))],
                out_specs=pl.BlockSpec((8, 128), lambda i: (i, 0)),
            )(w)
            jax.block_until_ready(out)
            ok = True
        except Exception:
            ok = False
    _BUFFERED_OK = ok
    return ok


def _const_spec(shape, use_buffered):
    """BlockSpec for a weight/bias that is identical for every grid step."""
    if use_buffered:
        return pl.BlockSpec(shape, lambda i: (0, 0), pipeline_mode=pl.Buffered(1))
    return pl.BlockSpec(shape, lambda i: (0, 0))


# ----------------------------------------------------------------------------
# Fused MLP kernel: all layers in one body, Z never leaves vregs/VMEM.
# ----------------------------------------------------------------------------
def _fused_mlp_kernel(*refs, n_hidden, activation, split_first):
    o_ref = refs[-1]
    if split_first:
        x_ref, c_ref = refs[0], refs[1]
        params = refs[2:-1]
        w0x, w0c, b0 = params[0], params[1], params[2]
        z = jnp.dot(x_ref[...].astype(w0x.dtype), w0x[...],
                    preferred_element_type=jnp.float32)
        z = z + jnp.dot(c_ref[...].astype(w0c.dtype), w0c[...],
                        preferred_element_type=jnp.float32)
        z = z + b0[...]
        params = params[3:]
    else:
        x_ref = refs[0]
        params = refs[1:-1]
        w0, b0 = params[0], params[1]
        z = jnp.dot(x_ref[...].astype(w0.dtype), w0[...],
                    preferred_element_type=jnp.float32) + b0[...]
        params = params[2:]
    z = _apply_act(z, activation)

    # remaining hidden layers (statically unrolled)
    for li in range(n_hidden - 1):
        w = params[2 * li]
        b = params[2 * li + 1]
        z = jnp.dot(z.astype(w.dtype), w[...],
                    preferred_element_type=jnp.float32) + b[...]
        z = _apply_act(z, activation)

    # output layer (no activation)
    w_out = params[2 * (n_hidden - 1)]
    b_out = params[2 * (n_hidden - 1) + 1]
    y = jnp.dot(z.astype(w_out.dtype), w_out[...],
                preferred_element_type=jnp.float32) + b_out[...]
    o_ref[...] = y.astype(o_ref.dtype)


# ----------------------------------------------------------------------------
# pallas_call wrapper
# ----------------------------------------------------------------------------
_VMEM_BUDGET = 48 * 1024 * 1024      # conservative: fits v7x's 64 MiB with headroom
_VMEM_FLOOR = 32 * 1024 * 1024
_VMEM_CEIL = 56 * 1024 * 1024


def _estimate_vmem(tm, in_widths, params, dout_pad, use_buffered):
    wbuf = 1 if use_buffered else 2
    weight_bytes = sum(int(p.size) * p.dtype.itemsize for p in params) * wbuf
    in_bytes = sum(2 * tm * w * 4 for w in in_widths)      # f32, double-buffered
    out_bytes = 2 * tm * dout_pad * 4
    widest = max([int(p.shape[-1]) for p in params] + [int(dout_pad)])
    act_bytes = 3 * tm * widest * 4                         # z (f32) + bf16 copy
    return weight_bytes + in_bytes + out_bytes + act_bytes


def _fused_mlp_pallas(x_pad, c_pad, params, activation, n_hidden, dout_pad,
                      tm, use_buffered, vmem_limit):
    B_pad = x_pad.shape[0]
    grid = (B_pad // tm,)
    split_first = c_pad is not None

    inputs = [x_pad]
    in_specs = [pl.BlockSpec((tm, x_pad.shape[1]), lambda i: (i, 0))]
    if split_first:
        inputs.append(c_pad)
        in_specs.append(pl.BlockSpec((tm, c_pad.shape[1]), lambda i: (i, 0)))
    for p in params:
        inputs.append(p)
        # weights/biases stay resident across the batch grid (same block each step)
        in_specs.append(_const_spec(p.shape, use_buffered))

    kernel = functools.partial(_fused_mlp_kernel, n_hidden=n_hidden,
                               activation=activation, split_first=split_first)
    return pl.pallas_call(
        kernel,
        out_shape=jax.ShapeDtypeStruct((B_pad, dout_pad), jnp.float32),
        grid=grid,
        in_specs=in_specs,
        out_specs=pl.BlockSpec((tm, dout_pad), lambda i: (i, 0)),
        compiler_params=pltpu.CompilerParams(
            dimension_semantics=("parallel",),   # batch tiles shard across TCs on v7x
            vmem_limit_bytes=int(vmem_limit),
        ),
    )(*inputs)


# ----------------------------------------------------------------------------
# Decoder module (param setup = plain JAX glue; compute = one fused kernel)
# ----------------------------------------------------------------------------
class Decoder:
    def __init__(self, n_inputs, n_outputs, hidden=(10,), activation="tanh",
                 key=jax.random.PRNGKey(0)):
        if activation not in ("tanh", "relu"):
            activation = "relu"                 # mirrors the PyTorch else-branch
        self.activation = activation
        self.n_inputs = int(n_inputs)
        self.n_outputs = int(n_outputs)
        self.hidden = tuple(int(h) for h in hidden)

        dims = [self.n_inputs] + list(self.hidden) + [self.n_outputs]
        self.weights, self.biases = [], []
        # Deterministic init mimicking nn.Linear default: U(-1/sqrt(fan_in), +)
        for i in range(len(dims) - 1):
            fan_in, fan_out = dims[i], dims[i + 1]
            key, kw, kb = jax.random.split(key, 3)
            bound = 1.0 / math.sqrt(fan_in)
            self.weights.append(jax.random.uniform(
                kw, (fan_in, fan_out), jnp.float32, minval=-bound, maxval=bound))
            self.biases.append(jax.random.uniform(
                kb, (fan_out,), jnp.float32, minval=-bound, maxval=bound))

        # --- padded, bf16 parameters, computed ONCE at init -------------------
        h0_pad = _pad_n(dims[1])
        self._w0_full = _pad_weight(self.weights[0], _pad_k(self.n_inputs), h0_pad)
        self._b0 = _pad_bias(self.biases[0], h0_pad)
        self._wb_tail = []                       # layers 1..end, flattened (w, b)
        for i in range(1, len(self.weights)):
            k_pad = _pad_n(dims[i])              # matches the 128-padded activation
            n_pad = _pad_n(dims[i + 1])
            self._wb_tail.append(_pad_weight(self.weights[i], k_pad, n_pad))
            self._wb_tail.append(_pad_bias(self.biases[i], n_pad))

        self._split_cache = {}                   # lat -> (W0[:lat], W0[lat:]) padded
        self._jit_cache = {}                     # mode -> jitted forward
        self._use_buffered = _buffered_supported()

    # ---- padded first-layer split (cached per latent size) ----
    def _get_split(self, lat):
        if lat not in self._split_cache:
            w0 = self.weights[0]
            h0_pad = self._w0_full.shape[1]
            cond = self.n_inputs - lat
            self._split_cache[lat] = (
                _pad_weight(w0[:lat], _pad_k(lat), h0_pad),
                _pad_weight(w0[lat:], _pad_k(cond), h0_pad),
            )
        return self._split_cache[lat]

    # ---- jitted forward (pad -> fused kernel -> slice), cached per mode ----
    def _get_forward(self, mode):
        if mode in self._jit_cache:
            return self._jit_cache[mode]

        activation = self.activation
        n_hidden = len(self.hidden)
        n_outputs = self.n_outputs
        use_buffered = self._use_buffered

        def _run(X, C, params):
            X = X.astype(jnp.float32)
            if mode == "merged":
                # lat+cond fit one 16-lane pad: one input stream, one W0 matmul.
                X = jnp.concatenate((X, C.astype(jnp.float32)), axis=1)
                C = None
            B = X.shape[0]
            dx_pad = params[0].shape[0]
            in_widths = [dx_pad]
            if mode == "split":
                dc_pad = params[1].shape[0]
                in_widths.append(dc_pad)
            dout_pad = params[-1].shape[1]

            tm = _choose_tm(B)
            while tm > 8 and _estimate_vmem(tm, in_widths, params, dout_pad,
                                            use_buffered) > _VMEM_BUDGET:
                tm = max(8, _round_up(tm // 2, 8))
            vmem_limit = min(_VMEM_CEIL, max(
                _VMEM_FLOOR,
                int(1.3 * _estimate_vmem(tm, in_widths, params, dout_pad,
                                         use_buffered))))
            B_pad = _round_up(B, tm)

            x_pad = jnp.pad(X, ((0, B_pad - B), (0, dx_pad - X.shape[1])))
            c_pad = None
            if mode == "split":
                Cf = C.astype(jnp.float32)
                c_pad = jnp.pad(Cf, ((0, B_pad - B), (0, dc_pad - Cf.shape[1])))

            out_pad = _fused_mlp_pallas(x_pad, c_pad, params, activation,
                                        n_hidden, dout_pad, tm, use_buffered,
                                        vmem_limit)
            return out_pad[:B, :n_outputs]

        if mode == "none":
            fn = jax.jit(lambda X, *params: _run(X, None, params))
        else:
            fn = jax.jit(lambda X, C, *params: _run(X, C, params))
        self._jit_cache[mode] = fn
        return fn

    def __call__(self, X, C=None):
        if C is None:
            assert X.shape[1] == self.n_inputs, "X width must equal n_inputs"
            params = (self._w0_full, self._b0) + tuple(self._wb_tail)
            return self._get_forward("none")(X, *params)
        lat, cond = int(X.shape[1]), int(C.shape[1])
        assert lat + cond == self.n_inputs, \
            "X.shape[1] + C.shape[1] must equal n_inputs"
        if _pad_k(lat) + _pad_k(cond) > _pad_k(lat + cond):
            # merging X||C saves padding / input DMA and first-layer MXU work
            params = (self._w0_full, self._b0) + tuple(self._wb_tail)
            return self._get_forward("merged")(X, C, *params)
        # split first-layer matmul: avoids materialising concat([X, C]) when
        # merging would not reduce padding anyway
        w0x, w0c = self._get_split(lat)
        params = (w0x, w0c, self._b0) + tuple(self._wb_tail)
        return self._get_forward("split")(X, C, *params)

    # pure-JAX reference for correctness checking
    def reference(self, X, C=None, matmul_dtype=jnp.float32):
        Z = X if C is None else jnp.concatenate((X, C), axis=1)
        Z = Z.astype(jnp.float32)
        act = jnp.tanh if self.activation == "tanh" else (lambda v: jnp.maximum(v, 0.0))
        for i in range(len(self.weights) - 1):
            h = jnp.dot(Z.astype(matmul_dtype), self.weights[i].astype(matmul_dtype),
                        preferred_element_type=jnp.float32) + self.biases[i]
            Z = act(h)
        return jnp.dot(Z.astype(matmul_dtype), self.weights[-1].astype(matmul_dtype),
                       preferred_element_type=jnp.float32) + self.biases[-1]


# ----------------------------------------------------------------------------
if __name__ == "__main__":
    key = jax.random.PRNGKey(0)
    k_x, k_c, k_p1, k_p2, k_x2, k_c2, k_p3 = jax.random.split(key, 7)

    # --- conditional decoder, merged first layer (lat+cond fit one 16-lane pad)
    batch, lat_size, cond_size = 32, 4, 4
    hidden, n_outputs = (32,), 16
    X = jax.random.normal(k_x, (batch, lat_size), jnp.float32)
    C = jax.random.normal(k_c, (batch, cond_size), jnp.float32)
    dec = Decoder(lat_size + cond_size, n_outputs, hidden=hidden,
                  activation="tanh", key=k_p1)
    out = jax.block_until_ready(dec(X, C))
    assert out.shape == (batch, n_outputs)
    # kernel logic vs a bf16-operand reference (tight)
    assert jnp.allclose(out, dec.reference(X, C, matmul_dtype=jnp.bfloat16),
                        atol=2e-3, rtol=2e-2)
    # vs the full-f32 reference (loose: bf16 operand quantization)
    assert jnp.allclose(out, dec.reference(X, C), atol=5e-2, rtol=5e-2)

    # --- unconditional path (C is None)
    dec2 = Decoder(lat_size, n_outputs, hidden=hidden, activation="tanh", key=k_p2)
    out2 = jax.block_until_ready(dec2(X))
    assert jnp.allclose(out2, dec2.reference(X, matmul_dtype=jnp.bfloat16),
                        atol=2e-3, rtol=2e-2)
    assert jnp.allclose(out2, dec2.reference(X), atol=5e-2, rtol=5e-2)

    # --- conditional decoder exercising the split-first-layer path
    lat3, cond3 = 16, 16
    X3 = jax.random.normal(k_x2, (8, lat3), jnp.float32)
    C3 = jax.random.normal(k_c2, (8, cond3), jnp.float32)
    dec3 = Decoder(lat3 + cond3, n_outputs, hidden=hidden, activation="relu",
                   key=k_p3)
    out3 = jax.block_until_ready(dec3(X3, C3))
    assert jnp.allclose(out3, dec3.reference(X3, C3, matmul_dtype=jnp.bfloat16),
                        atol=2e-3, rtol=2e-2)
    assert jnp.allclose(out3, dec3.reference(X3, C3), atol=5e-2, rtol=5e-2)

    print("KERNEL_OK")
</pallas_src>

<mosaic_0001>
module attributes {stable_mosaic.version = 11 : i64} {
  func.func @k(%arg0: i32, %arg1: memref<8x128xf32, #tpu.memory_space<vmem>>, %arg2: memref<8x128xf32, #tpu.memory_space<vmem>>) attributes {dimension_semantics = [#tpu.dimension_semantics<arbitrary>], iteration_bounds = array<i64: 2>, scalar_prefetch = 0 : i64, scratch_operands = 0 : i64, tpu.core_type = #tpu.core_type<tc>, window_params = [{pipeline_mode = #tpu.pipeline_mode<synchronous>, transform_indices = @transform_0, window_bounds = array<i64: 8, 128>}, {transform_indices = @transform_1, window_bounds = array<i64: 8, 128>}]} {
    %c0 = arith.constant 0 : index
    %c0_0 = arith.constant 0 : index
    %0 = vector.load %arg1[%c0, %c0_0] : memref<8x128xf32, #tpu.memory_space<vmem>>, vector<8x128xf32>
    %c0_1 = arith.constant 0 : index
    %c0_2 = arith.constant 0 : index
    %1 = vector.load %arg2[%c0_1, %c0_2] : memref<8x128xf32, #tpu.memory_space<vmem>>, vector<8x128xf32>
    tpu.vector_store %arg2[%c0_1, %c0_2], %0 {strides = array<i32>} : memref<8x128xf32, #tpu.memory_space<vmem>>, vector<8x128xf32>,
    return
  }
  func.func @transform_0(%arg0: i32) -> (i32, i32) {
    %c0_i32 = arith.constant 0 : i32
    %c0_i32_0 = arith.constant 0 : i32
    %c0_i32_1 = arith.constant 0 : i32
    return %c0_i32, %c0_i32_0 : i32, i32
  }
  func.func @transform_1(%arg0: i32) -> (i32, i32) {
    %c0_i32 = arith.constant 0 : i32
    %c0_i32_0 = arith.constant 0 : i32
    return %arg0, %c0_i32 : i32, i32
  }
}

module attributes {stable_mosaic.version = 11 : i64} {
  func.func @_fused_mlp_kernel(%arg0: i32, %arg1: memref<16x16xf32, #tpu.memory_space<vmem>>, %arg2: memref<16x128xbf16, #tpu.memory_space<vmem>>, %arg3: memref<1x128xf32, #tpu.memory_space<vmem>>, %arg4: memref<128x128xbf16, #tpu.memory_space<vmem>>, %arg5: memref<1x128xf32, #tpu.memory_space<vmem>>, %arg6: memref<16x128xf32, #tpu.memory_space<vmem>>) attributes {dimension_semantics = [#tpu.dimension_semantics<parallel>], iteration_bounds = array<i64: 2>, scalar_prefetch = 0 : i64, scratch_operands = 0 : i64, tpu.core_type = #tpu.core_type<tc>, window_params = [{transform_indices = @transform_0, window_bounds = array<i64: 16, 16>}, {pipeline_mode = #tpu.pipeline_mode<synchronous>, transform_indices = @transform_1, window_bounds = array<i64: 16, 128>}, {pipeline_mode = #tpu.pipeline_mode<synchronous>, transform_indices = @transform_2, window_bounds = array<i64: 1, 128>}, {pipeline_mode = #tpu.pipeline_mode<synchronous>, transform_indices = @transform_3, window_bounds = array<i64: 128, 128>}, {pipeline_mode = #tpu.pipeline_mode<synchronous>, transform_indices = @transform_4, window_bounds = array<i64: 1, 128>}, {transform_indices = @transform_5, window_bounds = array<i64: 16, 128>}]} {
    %c0 = arith.constant 0 : index
    %c0_0 = arith.constant 0 : index
    %0 = vector.load %arg1[%c0, %c0_0] : memref<16x16xf32, #tpu.memory_space<vmem>>, vector<16x16xf32>
    %1 = arith.truncf %0 : vector<16x16xf32> to vector<16x16xbf16>
    %c0_1 = arith.constant 0 : index
    %c0_2 = arith.constant 0 : index
    %2 = vector.load %arg2[%c0_1, %c0_2] : memref<16x128xbf16, #tpu.memory_space<vmem>>, vector<16x128xbf16>
    %cst = arith.constant dense<0.000000e+00> : vector<16x128xf32>
    %3 = tpu.matmul %1, %2, %cst {dimension_numbers = #tpu.dot_dimension_numbers<[1], [0], [0], [1], [0, 0, 1, 1], [], []>} : vector<16x16xbf16>, vector<16x128xbf16>, vector<16x128xf32> -> vector<16x128xf32>
    %c0_3 = arith.constant 0 : index
    %c0_4 = arith.constant 0 : index
    %4 = vector.load %arg3[%c0_3, %c0_4] : memref<1x128xf32, #tpu.memory_space<vmem>>, vector<1x128xf32>
    %5 = vector.broadcast %4 : vector<1x128xf32> to vector<16x128xf32>
    %6 = arith.addf %3, %5 : vector<16x128xf32>
    %7 = math.tanh %6 : vector<16x128xf32>
    %8 = arith.truncf %7 : vector<16x128xf32> to vector<16x128xbf16>
    %c0_5 = arith.constant 0 : index
    %c0_6 = arith.constant 0 : index
    %9 = vector.load %arg4[%c0_5, %c0_6] : memref<128x128xbf16, #tpu.memory_space<vmem>>, vector<128x128xbf16>
    %cst_7 = arith.constant dense<0.000000e+00> : vector<16x128xf32>
    %10 = tpu.matmul %8, %9, %cst_7 {dimension_numbers = #tpu.dot_dimension_numbers<[1], [0], [0], [1], [0, 0, 1, 1], [], []>} : vector<16x128xbf16>, vector<128x128xbf16>, vector<16x128xf32> -> vector<16x128xf32>
    %c0_8 = arith.constant 0 : index
    %c0_9 = arith.constant 0 : index
    %11 = vector.load %arg5[%c0_8, %c0_9] : memref<1x128xf32, #tpu.memory_space<vmem>>, vector<1x128xf32>
    %12 = vector.broadcast %11 : vector<1x128xf32> to vector<16x128xf32>
    %13 = arith.addf %10, %12 : vector<16x128xf32>
    %c0_10 = arith.constant 0 : index
    %c0_11 = arith.constant 0 : index
    %14 = vector.load %arg6[%c0_10, %c0_11] : memref<16x128xf32, #tpu.memory_space<vmem>>, vector<16x128xf32>
    tpu.vector_store %arg6[%c0_10, %c0_11], %13 {strides = array<i32>} : memref<16x128xf32, #tpu.memory_space<vmem>>, vector<16x128xf32>,
    return
  }
  func.func @transform_0(%arg0: i32) -> (i32, i32) {
    %c0_i32 = arith.constant 0 : i32
    %c0_i32_0 = arith.constant 0 : i32
    return %arg0, %c0_i32 : i32, i32
  }
  func.func @transform_1(%arg0: i32) -> (i32, i32) {
    %c0_i32 = arith.constant 0 : i32
    %c0_i32_0 = arith.constant 0 : i32
    %c0_i32_1 = arith.constant 0 : i32
    return %c0_i32, %c0_i32_0 : i32, i32
  }
  func.func @transform_2(%arg0: i32) -> (i32, i32) {
    %c0_i32 = arith.constant 0 : i32
    %c0_i32_0 = arith.constant 0 : i32
    %c0_i32_1 = arith.constant 0 : i32
    return %c0_i32, %c0_i32_0 : i32, i32
  }
  func.func @transform_3(%arg0: i32) -> (i32, i32) {
    %c0_i32 = arith.constant 0 : i32
    %c0_i32_0 = arith.constant 0 : i32
    %c0_i32_1 = arith.constant 0 : i32
    return %c0_i32, %c0_i32_0 : i32, i32
  }
  func.func @transform_4(%arg0: i32) -> (i32, i32) {
    %c0_i32 = arith.constant 0 : i32
    %c0_i32_0 = arith.constant 0 : i32
    %c0_i32_1 = arith.constant 0 : i32
    return %c0_i32, %c0_i32_0 : i32, i32
  }
  func.func @transform_5(%arg0: i32) -> (i32, i32) {
    %c0_i32 = arith.constant 0 : i32
    %c0_i32_0 = arith.constant 0 : i32
    return %arg0, %c0_i32 : i32, i32
  }
}

</mosaic_0001>

<bundles_post_ra>
// kernel: tpu_custom_call.1
= control target key start
LH: loop header
LB: loop body
LE: loop exit
PB: predicated region body
PF: predicated region fallthrough
CT: control target
= control target key end

     0   :  { %6 = vsyncpa [#allocation3], 0  ;;  %s481_s0 = inlined_call_operand.hbm [shape: f32[8,128], index: 0, kind: input, shape index: {}]   ;;  %s482_s1 = inlined_call_operand.hbm [shape: f32[16,128], index: 1, kind: output, shape index: {}]  }
   0x1   :  { %7 = vsyncpa [#allocation4], 0 }
   0x2   :  { %9 = vsyncpa [#allocation4 + $0x1], 0  ;;  %s351_s6 = smov 0   ;;  %s353_s7 = smov 0  }
   0x3   :  { %s355_s8 = smov 0   ;;  %s357_s9 = smov 0  }
   0x4 LB: > { %s372_s10 = sadd.s32 4294967295, %s337_s9   ;;  %s183_s11 = sadd.s32 4294967294, %s337_s9   ;;  %s337_s9 = sphi %s357_s9, %s498_s9   ;;  %s333_s8 = sphi %s355_s8, %s497_s8   ;;  %s329_s7 = sphi %s353_s7, %s496_s7   ;;  %s325_s6 = sphi %s351_s6, %s495_s6  }
   0x5   : > { %s376_s12 = sadd.s32 1, %s337_s9   ;;  %s43_s13 = sadd.s32 1, %s333_s8 }
   0x6   : > { %s40_s14 = ssub.s32 %s337_s9, %s376_s12  ;;  %p53_p0 = scmp.ne.s32.totalorder %s333_s8, %s329_s7 }
   0x7   : > { %p41_p1 = scmp.eq.s32.totalorder %s40_s14, 0  ;;  %p54_p2 = scmp.eq.s32.totalorder %s372_s10, 1 }
   0x8   : > { %p59_p3 = scmp.ne.s32.totalorder %s329_s7, %s325_s6  ;;  %p60_p4 = scmp.eq.s32.totalorder %s183_s11, 1 }
   0x9   : > { %s387_s15 = scalar_select %p41_p1, %s333_s8, %s43_s13  }
   0xa   : > { %p389_p5 = por %p54_p2, %p53_p0  ;;  %p393_p6 = por %p60_p4, %p59_p3 }
   0xb   : > { %p184_p7 = scmp.ge.s32.totalorder %s337_s9, 1  ;;  %p67_p8 = scmp.lt.s32.totalorder %s337_s9, 3 }
   0xc   : > { %s486_s16 = scalar_select %p389_p5, 1, 0 }
   0xd   : > { %s487_s17 = scalar_select %p393_p6, 1, 0 }
   0xe   : > { %p483_p9 = scmp.eq.s32.totalorder %s372_s10, 0  ;;  %p400_p10 = pnand %p184_p7, %p67_p8 }
   0xf   : > { %s339_s19 = smov [#allocation2]   ;;  %s243_s24 = scalar_lea.hbm %s481_s0, 128 }
  0x10   : > { %s488_s18 = scalar_select %p400_p10, 1, 0 }
  0x11   : > { %s80_s20 = sshll.u32 %s339_s19, 4  ;;  %p199_p11 = pneg %p400_p10  ;;  %s81_s20 = int_to_ptr.vmem [resolvable:$true] %s80_s20 }
  0x12   : > { %p244_p13 = scmp.ne.s32.totalorder %s481_s0, %s243_s24  ;;  %p250_p3 = scmp.lt.u32.totalorder %s243_s24, %s481_s0 }
  0x13   : > { %p408_p12 = pnand %p483_p9, %p199_p11 }
  0x15   : > { %p245_p0 = pneg %p408_p12 }
  0x17   : > { %p246_p1 = pnand %p245_p0, %p244_p13 }
  0x19   : > { %p247_p2 = pneg %p246_p1 }
  0x1b   : > { %p252_p4 = pnand %p250_p3, %p247_p2 }
  0x1d   : > { %255 = shalt.err (!%p252_p4)
}
  0x1e   : > { %s256_s29 = scalar_lea.vmem %s81_s20, 128  ;;  %p264_p9 = scmp.lt.s32.totalorder %s81_s20, %s81_s20 }
  0x1f   : > { %p257_p7 = scmp.ne.s32.totalorder %s81_s20, %s256_s29  ;;  %p265_p6 = scmp.lt.s32.totalorder %s256_s29, %s256_s29 }
  0x21   : > { %p259_p8 = pnand %p257_p7, %p245_p0  ;;  %p266_p5 = por %p265_p6, %p264_p9 }
  0x23   : > { %p260_p11 = pneg %p259_p8 }
  0x25   : > { %p267_p10 = pnand %p266_p5, %p260_p11 }
  0x27   : > { %270 = shalt.err (!%p267_p10)
}
  0x28   : > { %202 = dma.hbm_to_vmem [thread:$0]  (!%p408_p12), %s481_s0, 128, %s81_s20, [#allocation3]  }
  0x29   : > { %p490_p13 = scmp.ne.s32.totalorder %s488_s18, 0 }
  0x2a   : > { %p491_p1 = scmp.eq.s32.totalorder (!%p490_p13), %s372_s10, 0 }
  0x2b   : > { %93 = sbr.rel (%p490_p13) target bundleno = 77 (0x4d), region = 24 }
  0x32   : > { %316 = dma.done.wait (%p491_p1), [#allocation3], 128   ;;  %p492_p0 = pmov %p491_p1 }
  0x33   : > { %s105_s3 = sand.u32 1, %s329_s7   ;;  %s190_s13 = sshll.u32 %s372_s10, 7  ;;  %v108_v0 = vld [vmem:[#allocation2] sm:$0xff] }
  0x34   : > { %318 = vsyncadd (%p492_p0), [#allocation3], 4294967168  ;;  %s188_s4 = sshll.u32 %s105_s3, 3  ;;  %s441_s18 = scalar_lea.hbm %s482_s1, %s190_s13 }
  0x35   : > { %s107_s5 = scalar_lea.vmem [#allocation5], %s188_s4  ;;  %s111_s20 = scalar_lea.sflag [#allocation4], %s105_s3 }
  0x36   : > { %s124_s11 = sshll.u32 %s107_s5, 4  ;;  %109 = vst [vmem:[%s107_s5] sm:$0xff] %v108_v0  ;;  %p493_p6 = scmp.ne.s32.totalorder %s486_s16, 0  ;;  %s436_s11 = int_to_ptr.vmem [resolvable:$true] %s124_s11 }
  0x37   : > { %s271_s21 = scalar_lea.vmem %s436_s11, 128  ;;  %s340_s22 = smov [#allocation5]  }
  0x38   : > { %p272_p5 = scmp.ne.s32.totalorder %s436_s11, %s271_s21  ;;  %s275_s10 = sshll.u32 %s340_s22, 4  ;;  %s276_s10 = int_to_ptr.vmem [resolvable:$false] %s275_s10 }
  0x39   : > { %s277_s23 = scalar_lea.vmem %s276_s10, 256  ;;  %p278_p12 = scmp.lt.s32.totalorder %s436_s11, %s276_s10 }
  0x3a   : > { %p273_p9 = pnand %p272_p5, %p493_p6  ;;  %p279_p2 = scmp.lt.s32.totalorder %s277_s23, %s271_s21 }
  0x3c   : > { %p274_p10 = pneg %p273_p9  ;;  %p280_p3 = por %p279_p2, %p278_p12 }
  0x3e   : > { %p281_p4 = pnand %p280_p3, %p274_p10 }
  0x40   : > { %284 = shalt.err (!%p281_p4)
}
  0x41   : > { %s285_s24 = scalar_lea.hbm %s441_s18, 128  ;;  %s289_s27 = scalar_lea.hbm %s482_s1, 256 }
  0x42   : > { %p286_p7 = scmp.ne.s32.totalorder %s441_s18, %s285_s24  ;;  %p290_p13 = scmp.lt.u32.totalorder %s441_s18, %s482_s1 }
  0x43   : > { %p291_p1 = scmp.lt.u32.totalorder %s289_s27, %s285_s24  ;;  %p293_p5 = scmp.lt.u32.totalorder %s285_s24, %s441_s18 }
  0x44   : > { %p287_p8 = pnand %p286_p7, %p493_p6 }
  0x45   : > { %p292_p0 = por %p291_p1, %p290_p13 }
  0x46   : > { %p288_p11 = pneg %p287_p8 }
  0x47   : > { %p294_p9 = por %p293_p5, %p292_p0 }
  0x49   : > { %p295_p10 = pnand %p294_p9, %p288_p11 }
  0x4b   : > { %298 = shalt.err (!%p295_p10)
}
  0x4c   : > { %197 = dma.vmem_to_hbm [thread:$0]  (%p493_p6), %s436_s11, 128, %s441_s18, %s111_s20  }
  0x4d PF: > { %p209_p12 = scmp.ge.s32.totalorder %s337_s9, 2  ;;  %s136_s30 = sand.u32 1, %s325_s6  }
  0x4e   : > { %p494_p2 = scmp.ne.s32.totalorder %s487_s17, 0  ;;  %s137_s2 = scalar_lea.sflag [#allocation4], %s136_s30 }
  0x50   : > { %p204_p3 = pnand %p209_p12, %p494_p2 }
  0x52   : > { %320 = dma.done.wait (!%p204_p3), %s137_s2, 128  }
  0x53   : > { %322 = vsyncadd (!%p204_p3), %s137_s2, 4294967168  ;;  %p12_p4 = scmp.ge.s32.totalorder %s376_s12, 4   ;;  %s495_s6 = smov %s329_s7 }
  0x54   : > { %s496_s7 = smov %s333_s8  ;;  %s497_s8 = smov %s387_s15 }
  0x55   : > { %s498_s9 = smov %s376_s12  ;;  %14 = sbr.rel (!%p12_p4) target bundleno = 4 (0x4), region = 61 }
  0x5c   :  { %142 = vsyncpa [#allocation3], 1 }
  0x5d   :  { %144 = vsyncpa [#allocation3 + $0x1], 1 }
  0x5e   :  { %145 = vsyncpa [#allocation4], 1 }
  0x5f   :  { %147 = vsyncpa [#allocation4 + $0x1], 1 }

// kernel: _lambda_.1
= control target key start
LH: loop header
LB: loop body
LE: loop exit
PB: predicated region body
PF: predicated region fallthrough
CT: control target
= control target key end

     0   :  { %s588_s18 = smov 0   ;;  %s645_s0 = inlined_call_operand.vmem [shape: f32[32,16], index: 0, kind: input, shape index: {}]   ;;  %s646_s1 = inlined_call_operand.vmem [shape: bf16[16,128], index: 1, kind: input, shape index: {}]   ;;  %s647_s2 = inlined_call_operand.vmem [shape: f32[1,128], index: 2, kind: input, shape index: {}]   ;;  %s648_s3 = inlined_call_operand.vmem [shape: bf16[128,128], index: 3, kind: input, shape index: {}]   ;;  %s649_s4 = inlined_call_operand.vmem [shape: f32[1,128], index: 4, kind: input, shape index: {}]   ;;  %s650_s5 = inlined_call_operand.vmem [shape: f32[32,128], index: 5, kind: output, shape index: {}]  }
   0x1 LB: > { %s465_s19 = sadd.s32 4294967295, %s554_s18   ;;  %p469_p0 = scmp.ge.s32.totalorder %s554_s18, 1  ;;  %s554_s18 = sphi %s588_s18, %s15_s18  }
   0x2   : > { %p188_p1 = scmp.lt.s32.totalorder %s554_s18, 3 }
   0x4   : > { %p189_p2 = pnand %p469_p0, %p188_p1 }
   0x5   : > { %v535_v0 = vld [vmem:[%s646_s1] sm:$0xff] (!%p189_p2)   ;;  %v556_v1 = vmov (!%p189_p2), 0.0   ;;  %s470_s22 = sshll.u32 (!%p189_p2), %s465_s19, 1  ;;  %vm557_vm0 = vmmov (!%p189_p2), 0   ;;  %v537_v3 = vld [vmem:[%s648_s3 + $0x8] sm:$0xff] (!%p189_p2)   ;;  %v538_v4 = vld [vmem:[%s648_s3 + $0x10] sm:$0xff] (!%p189_p2)  }
   0x6   : > { %192 = sbr.rel (%p189_p2) target bundleno = 465 (0x1d1), region = 40  ;;  %499 = vmatprep.subr.bf16.mxu0 (!%p189_p2), %v556_v1  ;;  %505 = vmatprep.subr.bf16.mxu1 (!%p189_p2), %v556_v1  ;;  %v536_v2 = vld [vmem:[%s648_s3] sm:$0xff] (!%p189_p2)   ;;  %p217_p3 = scmp.lt.s32.totalorder (!%p189_p2), %s470_s22, 3  ;;  %vm247_vm1 = vcmask (!%p189_p2), 130048   ;;  %v539_v8 = vld [vmem:[%s648_s3 + $0x18] sm:$0xff] (!%p189_p2)   ;;  %v541_v10 = vld [vmem:[%s648_s3 + $0x28] sm:$0xff] (!%p189_p2)  }
   0x7   : > { %500 = vmatpush3.bf16.msra.mxu0 (!%p189_p2), %v535_v0  ;;  %501 = vmatprep.mubr.msk.bf16.mxu0 (!%p189_p2), %vm557_vm0, %v556_v1  ;;  %v540_v9 = vld [vmem:[%s648_s3 + $0x20] sm:$0xff] (!%p189_p2)   ;;  %v542_v11 = vld [vmem:[%s648_s3 + $0x30] sm:$0xff] (!%p189_p2)   ;;  %v543_v12 = vld [vmem:[%s648_s3 + $0x38] sm:$0xff] (!%p189_p2)  }
   0x8   : > { %506 = vmatpush3.bf16.msra.mxu1 (!%p189_p2), %v536_v2  ;;  %521 = vmatprep.mubr.msk.bf16.mxu1 (!%p189_p2), %vm557_vm0, %v556_v1  ;;  %v474_v13 = vld [vmem:[%s647_s2] ss:$0 sm:$0xff] (!%p189_p2) }
   0x9   : > { %507 = vmatprep.subr.bf16.mxu1 (!%p189_p2), %v556_v1  ;;  %v477_v23 = vld [vmem:[%s649_s4] ss:$0 sm:$0xff] (!%p189_p2) }
   0xc   : > { %508 = vmatpush3.bf16.msra.mxu1 (!%p189_p2), %v537_v3 }
   0xd   : > { %s652_s22 = smov (!%p217_p3, %s470_s22), 3  ;;  %509 = vmatprep.subr.bf16.mxu1 %v556_v1 }
   0xe   : > { %s471_s27 = sshll.u32 %s652_s22, 3 }
   0xf   : > { %s220_s7 = scalar_lea.vmem %s645_s0, %s471_s27  ;;  %s226_s26 = scalar_lea.vmem %s650_s5, %s471_s27 }
  0x10   : > { %v229_v5 = vld [vmem:[%s220_s7] sm:$0xff]  ;;  %v230_v6 = vld [vmem:[%s220_s7 + $0x8] sm:$0xff]  ;;  %510 = vmatpush3.bf16.msra.mxu1 %v538_v4 }
  0x11   : > { %v231_v7 = vpack.c.bf16 %v230_v6, %v229_v5  ;;  %511 = vmatprep.subr.bf16.mxu1 %v556_v1 }
  0x13   : > { %502 = vmatmul.mubr.msk.bf16.vlgmr.msra.gmra.mrb[0].mxu0 %vm247_vm1, %v231_v7 }
  0x14   : > { %512 = vmatpush3.bf16.msra.mxu1 %v539_v8 }
  0x15   : > { %513 = vmatprep.subr.bf16.mxu1 %v556_v1 }
  0x18   : > { %514 = vmatpush3.bf16.msra.mxu1 %v540_v9 }
  0x19   : > { %515 = vmatprep.subr.bf16.mxu1 %v556_v1 }
  0x1c   : > { %516 = vmatpush3.bf16.msra.mxu1 %v541_v10 }
  0x1d   : > { %517 = vmatprep.subr.bf16.mxu1 %v556_v1 }
  0x20   : > { %518 = vmatpush3.bf16.msra.mxu1 %v542_v11 }
  0x21   : > { %519 = vmatprep.subr.bf16.mxu1 %v556_v1 }
  0x24   : > { %520 = vmatpush3.bf16.msra.mxu1 %v543_v12 }
  0xe6   : > { %v285_v14 = vpop.f32.mrb[0].mxu0 }
  0xe7   : > { %v286_v15 = vadd.f32 %v474_v13, %v285_v14  ;;  %v503_v16 = vpop.f32.mrb[1].mxu0 }
  0xe8   : > { %v288_v17 = vpop.f32.mrb[2].mxu0 }
  0xe9   : > { %v289_v18 = vadd.f32 %v474_v13, %v288_v17  ;;  %v504_v19 = vpop.f32.mrb[3].mxu0  ;;  %544 = vtanh.f32 %v286_v15 }
  0xeb   : > { %546 = vtanh.f32 %v289_v18 }
  0xf3   : > { %v545_v20 = vpop.eup %544 }
  0xf5   : > { %v547_v21 = vpop.eup %546 }
  0xf6   : > { %v294_v22 = vpack.c.bf16 %v547_v21, %v545_v20 }
  0xf8   : > { %522 = vmatmul.mubr.bf16.vlgmr.msra.gmra.mrb[0].mxu1 %v294_v22 }
 0x1cb   : > { %v400_v24 = vpop.f32.mrb[0].mxu1 }
 0x1cc   : > { %v401_v25 = vadd.f32 %v477_v23, %v400_v24  ;;  %v523_v26 = vpop.f32.mrb[1].mxu1 }
 0x1cd   : > { %v403_v27 = vpop.f32.mrb[2].mxu1 }
 0x1ce   : > { %407 = vst [vmem:[%s226_s26] sm:$0xff] %v401_v25  ;;  %v404_v28 = vadd.f32 %v477_v23, %v403_v27  ;;  %v524_v29 = vpop.f32.mrb[3].mxu1 }
 0x1d0   : > { %408 = vst [vmem:[%s226_s26 + $0x8] sm:$0xff] %v404_v28 }
 0x1d1 PF: > { %s15_s18 = sadd.s32 1, %s554_s18  }
 0x1d2   : > { %p12_p4 = scmp.ge.s32.totalorder %s15_s18, 4  }
 0x1d4   :  { %14 = sbr.rel (!%p12_p4) target bundleno = 1 (0x1), region = 70 }

</bundles_post_ra>
